<compile_context>
chip_gen: v6e
topology: v6e:2x2x1
jax: 0.10.0
libtpu: 0.0.40
codegen_flags: <defaults>
</compile_context>

<pallas_src>
import numpy as np

import jax
import jax.numpy as jnp
from jax.experimental import pallas as pl
from jax.experimental.pallas import tpu as pltpu

LEAKY_SLOPE = 0.01      # nn.LeakyReLU default
LN_EPS = 1e-5           # nn.LayerNorm default
NORM_EPS = 1e-12        # F.normalize default


def _round_up(n, m):
    return ((n + m - 1) // m) * m


def _matryoshka_kernel(x_ref, w1_ref, b1_ref, g_ref, beta_ref,
                       w2_ref, b2_ref, w3_ref, b3_ref, o_ref):
    # Cast x to the matmul dtype *inside* the kernel (no separate HBM pass).
    x = x_ref[...].astype(w1_ref.dtype)                             # (TB, D)

    # --- base_transform -----------------------------------------------------
    # Linear(D -> 2D): operands may be bf16; accumulate in f32 on the MXU.
    h = jnp.dot(x, w1_ref[...], preferred_element_type=jnp.float32) + b1_ref[...]
    # LeakyReLU (single VPU max instead of cmp+select).
    h = jnp.maximum(h, LEAKY_SLOPE * h)
    # LayerNorm(2D): one-pass statistics, all in f32.
    mu = jnp.mean(h, axis=-1, keepdims=True)
    var = jnp.maximum(jnp.mean(h * h, axis=-1, keepdims=True) - mu * mu, 0.0)
    h = (h - mu) * jax.lax.rsqrt(var + LN_EPS) * g_ref[...] + beta_ref[...]
    # Dropout(0.1): identity in eval mode.
    # TODO(synk): training-mode stochastic dropout not reproduced (non-deterministic op).
    # Linear(2D -> 2D)
    h = jnp.dot(h.astype(w2_ref.dtype), w2_ref[...],
                preferred_element_type=jnp.float32) + b2_ref[...]
    h = jnp.maximum(h, LEAKY_SLOPE * h)                              # (TB, 2D)

    # --- Matryoshka block: delta = Linear(2D -> D) ---------------------------
    delta = jnp.dot(h.astype(w3_ref.dtype), w3_ref[...],
                    preferred_element_type=jnp.float32) + b3_ref[...]  # (TB, D)

    # --- cat([h, delta], dim=1) then F.normalize(p=2, dim=1) -----------------
    ss = (jnp.sum(h * h, axis=-1, keepdims=True)
          + jnp.sum(delta * delta, axis=-1, keepdims=True))
    # 1/max(sqrt(ss), eps) == rsqrt(max(ss, eps^2)); single EUP rsqrt.
    inv = jax.lax.rsqrt(jnp.maximum(ss, NORM_EPS * NORM_EPS))

    hd = h.shape[-1]
    dd = delta.shape[-1]
    # Direct slice stores into the lane-dense output buffer: no lane-axis
    # concat, no zero-fill of the pad lanes (they are never read back).
    o_ref[:, :hd] = (h * inv).astype(o_ref.dtype)
    o_ref[:, hd:hd + dd] = (delta * inv).astype(o_ref.dtype)


def make_params(key, input_dim):
    """Deterministic parameter init (PyTorch-Linear-like uniform, LN defaults)."""
    hidden = 2 * input_dim
    ks = jax.random.split(key, 6)

    def lin(kw, kb, fan_in, fan_out):
        bound = 1.0 / jnp.sqrt(fan_in)
        # Stored already transposed: (in, out), so the kernel does x @ W.
        w = jax.random.uniform(kw, (fan_in, fan_out), jnp.float32, -bound, bound)
        b = jax.random.uniform(kb, (1, fan_out), jnp.float32, -bound, bound)
        return w, b

    w1, b1 = lin(ks[0], ks[1], input_dim, hidden)      # base Linear 1
    gamma = jnp.ones((1, hidden), jnp.float32)          # LayerNorm weight
    beta = jnp.zeros((1, hidden), jnp.float32)          # LayerNorm bias
    w2, b2 = lin(ks[2], ks[3], hidden, hidden)          # base Linear 2
    w3, b3 = lin(ks[4], ks[5], hidden, input_dim)       # block Linear
    return (w1, b1, gamma, beta, w2, b2, w3, b3)


def matryoshka_forward(x, params, *, block_b=2048, matmul_dtype=None,
                       out_dtype=jnp.float32, min_grid_steps=2,
                       single_buffer_weights=None, trim_output=True):
    """Runs the Pallas kernel. Returns {dim_level: embedding} like the module.

    block_b:        max rows per batch tile (amortizes ~0.35us per grid step).
    matmul_dtype:   e.g. jnp.bfloat16 for MXU operands (f32 accumulation);
                    the weights are cast once in the wrapper, x inside the kernel.
    out_dtype:      output dtype (bf16 halves the dominant output HBM traffic).
    min_grid_steps: lower bound on grid steps so v7x's two TensorCores both run.
    single_buffer_weights: drop the weight double-buffer (pl.Buffered(1));
                    auto-enabled only when the weights are VMEM-relevant.
    trim_output:    slice off the 128-lane padding (an extra HBM copy); pass
                    False to get the padded slab and let the consumer fuse it.
    """
    B, input_dim = x.shape
    hidden = 2 * input_dim
    out_dim = 3 * input_dim                              # 2D (h) + D (delta)
    out_padded = _round_up(out_dim, 128)                 # lane-dense output slab
    out_dtype = np.dtype(out_dtype)

    # Sublane granularity of the blocked arrays: f32 -> 8, bf16 output -> 16.
    sub = 16 if out_dtype.itemsize == 2 else 8

    # Batch tile: large enough to amortize per-step overhead, small enough that
    # the grid has >= min_grid_steps steps (v7x megacore split), always a
    # multiple of the sublane granularity. No wrapper padding: the ragged last
    # block is masked by Pallas (all math is row-local, OOB writes dropped).
    tb = _round_up(max(pl.cdiv(B, min_grid_steps), 1), sub)
    tb = min(tb, _round_up(block_b, sub))
    tb = max(tb, sub)
    grid_b = pl.cdiv(B, tb)

    w1, b1, gamma, beta, w2, b2, w3, b3 = params
    if matmul_dtype is not None:
        # One-time, tiny cast of the weights only; x is cast inside the kernel.
        w1 = w1.astype(matmul_dtype)
        w2 = w2.astype(matmul_dtype)
        w3 = w3.astype(matmul_dtype)
    params = (w1, b1, gamma, beta, w2, b2, w3, b3)

    w_bytes = sum(int(p.size) * p.dtype.itemsize for p in (w1, w2, w3))
    small_bytes = sum(int(p.size) * p.dtype.itemsize
                      for p in (b1, gamma, beta, b2, b3))
    if single_buffer_weights is None:
        # Only drop the double-buffer when the weights actually pressure VMEM
        # (large input_dim); at small D the default pipeline never re-DMAs them.
        single_buffer_weights = w_bytes > (8 << 20)

    big_weight_idx = {0, 4, 6}          # w1, w2, w3 positions within params
    weight_specs = []
    for idx, p in enumerate(params):
        if idx in big_weight_idx and single_buffer_weights:
            weight_specs.append(
                pl.BlockSpec(p.shape, lambda i: (0, 0),
                             pipeline_mode=pl.Buffered(1)))
        else:
            weight_specs.append(pl.BlockSpec(p.shape, lambda i: (0, 0)))

    # VMEM budget: double-buffered x/out tiles + (1 or 2)x resident weights.
    x_tile = tb * input_dim * x.dtype.itemsize
    out_tile = tb * out_padded * out_dtype.itemsize
    w_buf = 1 if single_buffer_weights else 2
    vmem_need = 2 * (x_tile + out_tile) + w_buf * w_bytes + 2 * small_bytes
    vmem_limit = int(min(max(2 * vmem_need, 32 << 20), 100 << 20))

    flops = 2 * B * (input_dim * hidden + hidden * hidden + hidden * input_dim)
    bytes_accessed = (B * input_dim * x.dtype.itemsize
                      + B * out_padded * out_dtype.itemsize
                      + w_bytes + small_bytes)
    cost = pl.CostEstimate(flops=flops, transcendentals=2 * B,
                           bytes_accessed=bytes_accessed)

    out = pl.pallas_call(
        _matryoshka_kernel,
        out_shape=jax.ShapeDtypeStruct((B, out_padded), out_dtype),
        grid=(grid_b,),
        in_specs=[pl.BlockSpec((tb, input_dim), lambda i: (i, 0))] + weight_specs,
        out_specs=pl.BlockSpec((tb, out_padded), lambda i: (i, 0)),
        compiler_params=pltpu.CompilerParams(
            dimension_semantics=("parallel",),
            vmem_limit_bytes=vmem_limit),
        cost_estimate=cost,
    )(x, *params)

    # Lane-padding slice (XLA copy unless fused); keep for the PyTorch-shaped
    # API, or pass trim_output=False to return the padded slab directly.
    emb = out[:, :out_dim] if trim_output else out
    return {input_dim: emb}


def matryoshka_forward_ref(x, params):
    """Pure-JAX f32 reference for correctness checking (mirrors PyTorch)."""
    w1, b1, gamma, beta, w2, b2, w3, b3 = params
    h = x @ w1 + b1
    h = jnp.where(h > 0, h, LEAKY_SLOPE * h)
    mu = jnp.mean(h, axis=-1, keepdims=True)
    var = jnp.mean(jnp.square(h - mu), axis=-1, keepdims=True)
    h = (h - mu) / jnp.sqrt(var + LN_EPS) * gamma + beta
    h = h @ w2 + b2
    h = jnp.where(h > 0, h, LEAKY_SLOPE * h)
    delta = h @ w3 + b3
    cat = jnp.concatenate([h, delta], axis=1)
    nrm = jnp.maximum(jnp.sqrt(jnp.sum(cat * cat, axis=1, keepdims=True)), NORM_EPS)
    return {x.shape[1]: cat / nrm}


if __name__ == "__main__":
    key = jax.random.PRNGKey(0)
    k_x, k_p, k_x2 = jax.random.split(key, 3)

    batch, input_dim = 8, 32           # dimension_levels = [32]
    params = make_params(k_p, input_dim)

    # 1) Small-shape f32 path (single grid step), tight check.
    x = jax.random.normal(k_x, (batch, input_dim), jnp.float32)
    out = matryoshka_forward(x, params)
    out = jax.tree_util.tree_map(jax.block_until_ready, out)
    ref = matryoshka_forward_ref(x, params)
    for dim in out:
        assert out[dim].shape == (batch, 3 * input_dim)
        assert jnp.allclose(out[dim], ref[dim], atol=3e-5), "f32 mismatch vs reference"

    # 2) Multi-step parallel grid with a ragged last block + bf16 MXU operands
    #    and bf16 output (f32 accumulation/elementwise inside), loosened tol.
    batch2 = 300
    x2 = jax.random.normal(k_x2, (batch2, input_dim), jnp.float32)
    out2 = matryoshka_forward(x2, params, block_b=128,
                              matmul_dtype=jnp.bfloat16, out_dtype=jnp.bfloat16)
    out2 = jax.tree_util.tree_map(jax.block_until_ready, out2)
    ref2 = matryoshka_forward_ref(x2, params)
    for dim in out2:
        assert out2[dim].shape == (batch2, 3 * input_dim)
        assert jnp.allclose(out2[dim].astype(jnp.float32), ref2[dim], atol=5e-2), \
            "bf16 mismatch vs reference"

    print("KERNEL_OK")
</pallas_src>

<mosaic_0001>
module attributes {stable_mosaic.version = 11 : i64} {
  func.func @_matryoshka_kernel(%arg0: i32, %arg1: memref<8x32xf32, #tpu.memory_space<vmem>>, %arg2: memref<32x64xf32, #tpu.memory_space<vmem>>, %arg3: memref<1x64xf32, #tpu.memory_space<vmem>>, %arg4: memref<1x64xf32, #tpu.memory_space<vmem>>, %arg5: memref<1x64xf32, #tpu.memory_space<vmem>>, %arg6: memref<64x64xf32, #tpu.memory_space<vmem>>, %arg7: memref<1x64xf32, #tpu.memory_space<vmem>>, %arg8: memref<64x32xf32, #tpu.memory_space<vmem>>, %arg9: memref<1x32xf32, #tpu.memory_space<vmem>>, %arg10: memref<8x128xf32, #tpu.memory_space<vmem>>) attributes {dimension_semantics = [#tpu.dimension_semantics<parallel>], iteration_bounds = array<i64: 1>, scalar_prefetch = 0 : i64, scratch_operands = 0 : i64, tpu.core_type = #tpu.core_type<tc>, window_params = [{transform_indices = @transform_0, window_bounds = array<i64: 8, 32>}, {pipeline_mode = #tpu.pipeline_mode<synchronous>, transform_indices = @transform_1, window_bounds = array<i64: 32, 64>}, {pipeline_mode = #tpu.pipeline_mode<synchronous>, transform_indices = @transform_2, window_bounds = array<i64: 1, 64>}, {pipeline_mode = #tpu.pipeline_mode<synchronous>, transform_indices = @transform_3, window_bounds = array<i64: 1, 64>}, {pipeline_mode = #tpu.pipeline_mode<synchronous>, transform_indices = @transform_4, window_bounds = array<i64: 1, 64>}, {pipeline_mode = #tpu.pipeline_mode<synchronous>, transform_indices = @transform_5, window_bounds = array<i64: 64, 64>}, {pipeline_mode = #tpu.pipeline_mode<synchronous>, transform_indices = @transform_6, window_bounds = array<i64: 1, 64>}, {pipeline_mode = #tpu.pipeline_mode<synchronous>, transform_indices = @transform_7, window_bounds = array<i64: 64, 32>}, {pipeline_mode = #tpu.pipeline_mode<synchronous>, transform_indices = @transform_8, window_bounds = array<i64: 1, 32>}, {transform_indices = @transform_9, window_bounds = array<i64: 8, 128>}]} {
    %c0 = arith.constant 0 : index
    %c0_0 = arith.constant 0 : index
    %0 = vector.load %arg1[%c0, %c0_0] : memref<8x32xf32, #tpu.memory_space<vmem>>, vector<8x32xf32>
    %c0_1 = arith.constant 0 : index
    %c0_2 = arith.constant 0 : index
    %1 = vector.load %arg2[%c0_1, %c0_2] : memref<32x64xf32, #tpu.memory_space<vmem>>, vector<32x64xf32>
    %cst = arith.constant dense<0.000000e+00> : vector<8x64xf32>
    %2 = tpu.matmul %0, %1, %cst {dimension_numbers = #tpu.dot_dimension_numbers<[1], [0], [0], [1], [0, 0, 1, 1], [], []>} : vector<8x32xf32>, vector<32x64xf32>, vector<8x64xf32> -> vector<8x64xf32>
    %c0_3 = arith.constant 0 : index
    %c0_4 = arith.constant 0 : index
    %3 = vector.load %arg3[%c0_3, %c0_4] : memref<1x64xf32, #tpu.memory_space<vmem>>, vector<1x64xf32>
    %4 = vector.broadcast %3 : vector<1x64xf32> to vector<8x64xf32>
    %5 = arith.addf %2, %4 : vector<8x64xf32>
    %cst_5 = arith.constant 0.00999999977 : f32
    %6 = vector.broadcast %cst_5 : f32 to vector<8x64xf32>
    %7 = arith.mulf %6, %5 : vector<8x64xf32>
    %8 = arith.maximumf %5, %7 : vector<8x64xf32>
    %cst_6 = arith.constant dense<0.000000e+00> : vector<8xf32>
    %9 = vector.multi_reduction <add>, %8, %cst_6 [1] : vector<8x64xf32> to vector<8xf32>
    %10 = vector.shape_cast %9 : vector<8xf32> to vector<8x1xf32>
    %cst_7 = arith.constant 6.400000e+01 : f32
    %11 = vector.broadcast %cst_7 : f32 to vector<8x1xf32>
    %12 = arith.divf %10, %11 : vector<8x1xf32>
    %13 = arith.mulf %8, %8 : vector<8x64xf32>
    %cst_8 = arith.constant dense<0.000000e+00> : vector<8xf32>
    %14 = vector.multi_reduction <add>, %13, %cst_8 [1] : vector<8x64xf32> to vector<8xf32>
    %15 = vector.shape_cast %14 : vector<8xf32> to vector<8x1xf32>
    %cst_9 = arith.constant 6.400000e+01 : f32
    %16 = vector.broadcast %cst_9 : f32 to vector<8x1xf32>
    %17 = arith.divf %15, %16 : vector<8x1xf32>
    %18 = arith.mulf %12, %12 : vector<8x1xf32>
    %19 = arith.subf %17, %18 : vector<8x1xf32>
    %cst_10 = arith.constant 0.000000e+00 : f32
    %20 = vector.broadcast %cst_10 : f32 to vector<8x1xf32>
    %21 = arith.maximumf %19, %20 : vector<8x1xf32>
    %22 = vector.broadcast %12 : vector<8x1xf32> to vector<8x64xf32>
    %23 = arith.subf %8, %22 : vector<8x64xf32>
    %cst_11 = arith.constant 9.99999974E-6 : f32
    %24 = vector.broadcast %cst_11 : f32 to vector<8x1xf32>
    %25 = arith.addf %21, %24 : vector<8x1xf32>
    %26 = math.rsqrt %25 : vector<8x1xf32>
    %27 = vector.broadcast %26 : vector<8x1xf32> to vector<8x64xf32>
    %28 = arith.mulf %23, %27 : vector<8x64xf32>
    %c0_12 = arith.constant 0 : index
    %c0_13 = arith.constant 0 : index
    %29 = vector.load %arg4[%c0_12, %c0_13] : memref<1x64xf32, #tpu.memory_space<vmem>>, vector<1x64xf32>
    %30 = vector.broadcast %29 : vector<1x64xf32> to vector<8x64xf32>
    %31 = arith.mulf %28, %30 : vector<8x64xf32>
    %c0_14 = arith.constant 0 : index
    %c0_15 = arith.constant 0 : index
    %32 = vector.load %arg5[%c0_14, %c0_15] : memref<1x64xf32, #tpu.memory_space<vmem>>, vector<1x64xf32>
    %33 = vector.broadcast %32 : vector<1x64xf32> to vector<8x64xf32>
    %34 = arith.addf %31, %33 : vector<8x64xf32>
    %c0_16 = arith.constant 0 : index
    %c0_17 = arith.constant 0 : index
    %35 = vector.load %arg6[%c0_16, %c0_17] : memref<64x64xf32, #tpu.memory_space<vmem>>, vector<64x64xf32>
    %cst_18 = arith.constant dense<0.000000e+00> : vector<8x64xf32>
    %36 = tpu.matmul %34, %35, %cst_18 {dimension_numbers = #tpu.dot_dimension_numbers<[1], [0], [0], [1], [0, 0, 1, 1], [], []>} : vector<8x64xf32>, vector<64x64xf32>, vector<8x64xf32> -> vector<8x64xf32>
    %c0_19 = arith.constant 0 : index
    %c0_20 = arith.constant 0 : index
    %37 = vector.load %arg7[%c0_19, %c0_20] : memref<1x64xf32, #tpu.memory_space<vmem>>, vector<1x64xf32>
    %38 = vector.broadcast %37 : vector<1x64xf32> to vector<8x64xf32>
    %39 = arith.addf %36, %38 : vector<8x64xf32>
    %cst_21 = arith.constant 0.00999999977 : f32
    %40 = vector.broadcast %cst_21 : f32 to vector<8x64xf32>
    %41 = arith.mulf %40, %39 : vector<8x64xf32>
    %42 = arith.maximumf %39, %41 : vector<8x64xf32>
    %c0_22 = arith.constant 0 : index
    %c0_23 = arith.constant 0 : index
    %43 = vector.load %arg8[%c0_22, %c0_23] : memref<64x32xf32, #tpu.memory_space<vmem>>, vector<64x32xf32>
    %cst_24 = arith.constant dense<0.000000e+00> : vector<8x32xf32>
    %44 = tpu.matmul %42, %43, %cst_24 {dimension_numbers = #tpu.dot_dimension_numbers<[1], [0], [0], [1], [0, 0, 1, 1], [], []>} : vector<8x64xf32>, vector<64x32xf32>, vector<8x32xf32> -> vector<8x32xf32>
    %c0_25 = arith.constant 0 : index
    %c0_26 = arith.constant 0 : index
    %45 = vector.load %arg9[%c0_25, %c0_26] : memref<1x32xf32, #tpu.memory_space<vmem>>, vector<1x32xf32>
    %46 = vector.broadcast %45 : vector<1x32xf32> to vector<8x32xf32>
    %47 = arith.addf %44, %46 : vector<8x32xf32>
    %48 = arith.mulf %42, %42 : vector<8x64xf32>
    %cst_27 = arith.constant dense<0.000000e+00> : vector<8xf32>
    %49 = vector.multi_reduction <add>, %48, %cst_27 [1] : vector<8x64xf32> to vector<8xf32>
    %50 = vector.shape_cast %49 : vector<8xf32> to vector<8x1xf32>
    %51 = arith.mulf %47, %47 : vector<8x32xf32>
    %cst_28 = arith.constant dense<0.000000e+00> : vector<8xf32>
    %52 = vector.multi_reduction <add>, %51, %cst_28 [1] : vector<8x32xf32> to vector<8xf32>
    %53 = vector.shape_cast %52 : vector<8xf32> to vector<8x1xf32>
    %54 = arith.addf %50, %53 : vector<8x1xf32>
    %cst_29 = arith.constant 1.000000e-24 : f32
    %55 = vector.broadcast %cst_29 : f32 to vector<8x1xf32>
    %56 = arith.maximumf %54, %55 : vector<8x1xf32>
    %57 = math.rsqrt %56 : vector<8x1xf32>
    %58 = vector.broadcast %57 : vector<8x1xf32> to vector<8x64xf32>
    %59 = arith.mulf %42, %58 : vector<8x64xf32>
    %c0_30 = arith.constant 0 : index
    %c0_31 = arith.constant 0 : index
    %60 = vector.load %arg10[%c0_30, %c0_31] : memref<8x128xf32, #tpu.memory_space<vmem>>, vector<8x64xf32>
    tpu.vector_store %arg10[%c0_30, %c0_31], %59 {strides = array<i32>} : memref<8x128xf32, #tpu.memory_space<vmem>>, vector<8x64xf32>,
    %61 = vector.broadcast %57 : vector<8x1xf32> to vector<8x32xf32>
    %62 = arith.mulf %47, %61 : vector<8x32xf32>
    %c0_32 = arith.constant 0 : index
    %c64 = arith.constant 64 : index
    %63 = vector.load %arg10[%c0_32, %c64] : memref<8x128xf32, #tpu.memory_space<vmem>>, vector<8x32xf32>
    tpu.vector_store %arg10[%c0_32, %c64], %62 {strides = array<i32>} : memref<8x128xf32, #tpu.memory_space<vmem>>, vector<8x32xf32>,
    return
  }
  func.func @transform_0(%arg0: i32) -> (i32, i32) {
    %c0_i32 = arith.constant 0 : i32
    %c0_i32_0 = arith.constant 0 : i32
    return %arg0, %c0_i32 : i32, i32
  }
  func.func @transform_1(%arg0: i32) -> (i32, i32) {
    %c0_i32 = arith.constant 0 : i32
    %c0_i32_0 = arith.constant 0 : i32
    %c0_i32_1 = arith.constant 0 : i32
    return %c0_i32, %c0_i32_0 : i32, i32
  }
  func.func @transform_2(%arg0: i32) -> (i32, i32) {
    %c0_i32 = arith.constant 0 : i32
    %c0_i32_0 = arith.constant 0 : i32
    %c0_i32_1 = arith.constant 0 : i32
    return %c0_i32, %c0_i32_0 : i32, i32
  }
  func.func @transform_3(%arg0: i32) -> (i32, i32) {
    %c0_i32 = arith.constant 0 : i32
    %c0_i32_0 = arith.constant 0 : i32
    %c0_i32_1 = arith.constant 0 : i32
    return %c0_i32, %c0_i32_0 : i32, i32
  }
  func.func @transform_4(%arg0: i32) -> (i32, i32) {
    %c0_i32 = arith.constant 0 : i32
    %c0_i32_0 = arith.constant 0 : i32
    %c0_i32_1 = arith.constant 0 : i32
    return %c0_i32, %c0_i32_0 : i32, i32
  }
  func.func @transform_5(%arg0: i32) -> (i32, i32) {
    %c0_i32 = arith.constant 0 : i32
    %c0_i32_0 = arith.constant 0 : i32
    %c0_i32_1 = arith.constant 0 : i32
    return %c0_i32, %c0_i32_0 : i32, i32
  }
  func.func @transform_6(%arg0: i32) -> (i32, i32) {
    %c0_i32 = arith.constant 0 : i32
    %c0_i32_0 = arith.constant 0 : i32
    %c0_i32_1 = arith.constant 0 : i32
    return %c0_i32, %c0_i32_0 : i32, i32
  }
  func.func @transform_7(%arg0: i32) -> (i32, i32) {
    %c0_i32 = arith.constant 0 : i32
    %c0_i32_0 = arith.constant 0 : i32
    %c0_i32_1 = arith.constant 0 : i32
    return %c0_i32, %c0_i32_0 : i32, i32
  }
  func.func @transform_8(%arg0: i32) -> (i32, i32) {
    %c0_i32 = arith.constant 0 : i32
    %c0_i32_0 = arith.constant 0 : i32
    %c0_i32_1 = arith.constant 0 : i32
    return %c0_i32, %c0_i32_0 : i32, i32
  }
  func.func @transform_9(%arg0: i32) -> (i32, i32) {
    %c0_i32 = arith.constant 0 : i32
    %c0_i32_0 = arith.constant 0 : i32
    return %arg0, %c0_i32 : i32, i32
  }
}

</mosaic_0001>

<bundles_post_ra>
// kernel: tpu_custom_call.1
= control target key start
LH: loop header
LB: loop body
LE: loop exit
PB: predicated region body
PF: predicated region fallthrough
CT: control target
= control target key end

     0   :  { %14 = vsyncpa [#allocation3], 0  ;;  %s720_s0 = inlined_call_operand.vmem [shape: f32[8,32], index: 0, kind: input, shape index: {}]   ;;  %s721_s1 = inlined_call_operand.vmem [shape: f32[32,64], index: 1, kind: input, shape index: {}]   ;;  %s722_s2 = inlined_call_operand.vmem [shape: f32[1,64], index: 2, kind: input, shape index: {}]   ;;  %s723_s3 = inlined_call_operand.hbm [shape: f32[1,64], index: 3, kind: input, shape index: {}]   ;;  %s724_s4 = inlined_call_operand.hbm [shape: f32[1,64], index: 4, kind: input, shape index: {}]   ;;  %s725_s5 = inlined_call_operand.vmem [shape: f32[64,64], index: 5, kind: input, shape index: {}]   ;;  %s726_s6 = inlined_call_operand.vmem [shape: f32[1,64], index: 6, kind: input, shape index: {}]   ;;  %s727_s7 = inlined_call_operand.vmem [shape: f32[64,32], index: 7, kind: input, shape index: {}]   ;;  %s728_s8 = inlined_call_operand.vmem [shape: f32[1,32], index: 8, kind: input, shape index: {}]   ;;  %s729_s9 = inlined_call_operand.hbm [shape: f32[8,128], index: 9, kind: output, shape index: {}]  }
   0x1   :  { %15 = vsyncpa [#allocation6], 0 }
   0x2   :  { %16 = vsyncpa [#allocation4], 0  ;;  %s549_s30 = smov [#allocation2]   ;;  %s550_s11 = smov [#allocation5]  }
   0x3   :  { %s29_s10 = sshll.u32 %s549_s30, 4  ;;  %s39_s12 = sshll.u32 %s550_s11, 4  ;;  %s30_s10 = int_to_ptr.vmem [resolvable:$true] %s29_s10  ;;  %s40_s12 = int_to_ptr.vmem [resolvable:$true] %s39_s12 }
   0x4   :  { %s491_s13 = scalar_lea.vmem %s30_s10, 16  ;;  %s495_s14 = scalar_lea.vmem %s30_s10, 32 }
   0x5   :  { %p492_p0 = scmp.ne.s32.totalorder %s30_s10, %s491_s13  ;;  %p496_p1 = scmp.lt.s32.totalorder %s30_s10, %s30_s10 }
   0x6   :  { %p497_p2 = scmp.lt.s32.totalorder %s495_s14, %s491_s13 }
   0x8   :  { %p498_p3 = por %p497_p2, %p496_p1 }
   0xa   :  { %p499_p4 = pnand %p498_p3, %p492_p0 }
   0xc   :  { %502 = shalt.err (!%p499_p4)
}
   0xd   :  { %32 = dma.hbm_to_vmem [thread:$0]  %s723_s3, 16, %s30_s10, [#allocation3]  }
   0xe   :  { %s511_s17 = scalar_lea.vmem %s40_s12, 16  ;;  %s515_s18 = scalar_lea.vmem %s40_s12, 32 }
   0xf   :  { %p512_p5 = scmp.ne.s32.totalorder %s40_s12, %s511_s17  ;;  %p516_p6 = scmp.lt.s32.totalorder %s40_s12, %s40_s12 }
  0x10   :  { %p517_p7 = scmp.lt.s32.totalorder %s515_s18, %s511_s17 }
  0x12   :  { %p518_p8 = por %p517_p7, %p516_p6 }
  0x14   :  { %p519_p9 = pnand %p518_p8, %p512_p5 }
  0x16   :  { %522 = shalt.err (!%p519_p9)
}
  0x17   :  { %42 = dma.hbm_to_vmem [thread:$0]  %s724_s4, 16, %s40_s12, [#allocation6]  }
  0x18   :  { %543 = dma.done.wait [#allocation3], 16  }
  0x19   :  { %544 = vsyncadd [#allocation3], 4294967280 }
  0x1a   :  { %545 = dma.done.wait [#allocation6], 16  }
  0x1b   :  { %546 = vsyncadd [#allocation6], 4294967280  ;;  %v551_v0 = vmov 0.0   ;;  %vm552_vm0 = vmmov 0   ;;  %v61_v1 = vld [vmem:[%s721_s1 + $0x18] sm:$0xff]  ;;  %v60_v2 = vld [vmem:[%s721_s1 + $0x10] sm:$0xff] }
  0x1c   :  { %424 = vmatprep.subr.mxu0 %v551_v0  ;;  %432 = vmatprep.mubr.msk.f32.mxu0 %vm552_vm0, %v551_v0  ;;  %v59_v3 = vld [vmem:[%s721_s1 + $0x8] sm:$0xff]  ;;  %v58_v4 = vld [vmem:[%s721_s1] sm:$0xff]  ;;  %vm69_vm1 = vcmask 261120   ;;  %vm145_vm2 = vcmask 523264   ;;  %v186_v15 = vld [vmem:[%s725_s5 + $0x38] sm:$0xff]  ;;  %vm375_vm3 = vcmask 785920  }
  0x1d   :  { %435 = vmatprep.subr.mxu1 %v551_v0  ;;  %451 = vmatprep.mubr.msk.f32.mxu1 %vm552_vm0, %v551_v0  ;;  %v57_v5 = vld [vmem:[%s720_s0] sm:$0xff]  ;;  %v185_v16 = vld [vmem:[%s725_s5 + $0x30] sm:$0xff]  ;;  %v184_v17 = vld [vmem:[%s725_s5 + $0x28] sm:$0xff] }
  0x1e   :  { %425 = vmatpush3.msra.mxu0 %v61_v1  ;;  %v393_v6 = vld [vmem:[%s722_s2] ss:$0 sm:$0xff]  ;;  %436 = vmatpush3.msra.mxu1 %v186_v15  ;;  %v182_v19 = vld [vmem:[%s725_s5 + $0x18] sm:$0xff]  ;;  %v181_v20 = vld [vmem:[%s725_s5 + $0x10] sm:$0xff] }
  0x1f   :  { %426 = vmatprep.subr.mxu0 %v551_v0  ;;  %437 = vmatprep.subr.mxu1 %v551_v0  ;;  %v183_v18 = vld [vmem:[%s725_s5 + $0x20] sm:$0xff]  ;;  %v180_v21 = vld [vmem:[%s725_s5 + $0x8] sm:$0xff]  ;;  %v276_v23 = vld [vmem:[%s727_s7 + $0x38] sm:$0xff] }
  0x20   :  { %427 = vmatpush3.msra.mxu0 %v60_v2  ;;  %438 = vmatpush3.msra.mxu1 %v185_v16  ;;  %v179_v22 = vld [vmem:[%s725_s5] sm:$0xff]  ;;  %v275_v24 = vld [vmem:[%s727_s7 + $0x30] sm:$0xff]  ;;  %v274_v25 = vld [vmem:[%s727_s7 + $0x28] sm:$0xff] }
  0x21   :  { %428 = vmatprep.subr.mxu0 %v551_v0  ;;  %439 = vmatprep.subr.mxu1 %v551_v0  ;;  %v273_v26 = vld [vmem:[%s727_s7 + $0x20] sm:$0xff]  ;;  %v272_v42 = vld [vmem:[%s727_s7 + $0x18] sm:$0xff]  ;;  %v271_v43 = vld [vmem:[%s727_s7 + $0x10] sm:$0xff] }
  0x22   :  { %429 = vmatpush3.msra.mxu0 %v59_v3  ;;  %440 = vmatpush3.msra.mxu1 %v184_v17  ;;  %v395_v37 = vld [vmem:[#allocation2] ss:$0 sm:$0xff]  ;;  %v396_v39 = vld [vmem:[#allocation5] ss:$0 sm:$0xff]  ;;  %v270_v44 = vld [vmem:[%s727_s7 + $0x8] sm:$0xff] }
  0x23   :  { %430 = vmatprep.subr.mxu0 %v551_v0  ;;  %441 = vmatprep.subr.mxu1 %v551_v0  ;;  %v269_v45 = vld [vmem:[%s727_s7] sm:$0xff]  ;;  %s554_s7 = smov [#allocation7]  }
  0x24   :  { %431 = vmatpush3.msra.mxu0 %v58_v4  ;;  %442 = vmatpush3.msra.mxu1 %v183_v18  ;;  %v397_v46 = vld [vmem:[%s726_s6] ss:$0 sm:$0xff]  ;;  %s553_s6 = smov 64  }
  0x25   :  { %433 = vmatmul.mubr.msk.f32.vlgmr.msra.gmra.mxu0 %vm69_vm1, %v57_v5  ;;  %454 = vmatprep.subr.mxu0 %v551_v0  ;;  %v399_v54 = vld [vmem:[%s728_s8] ss:$0 sm:$0xff]  ;;  %s383_s8 = sshll.u32 %s554_s7, 4  ;;  %s384_s8 = int_to_ptr.vmem [resolvable:$true] %s383_s8 }
  0x26   :  { %470 = vmatprep.mubr.msk.f32.mxu0 %vm552_vm0, %v551_v0  ;;  %443 = vmatprep.subr.mxu1 %v551_v0  ;;  %s523_s16 = scalar_lea.vmem %s384_s8, 128  ;;  %p528_p11 = scmp.lt.s32.totalorder %s384_s8, %s384_s8 }
  0x27   :  { %444 = vmatpush3.msra.mxu1 %v182_v19  ;;  %455 = vmatpush3.msra.mxu0 %v276_v23  ;;  %p524_p10 = scmp.ne.s32.totalorder %s384_s8, %s523_s16  ;;  %p529_p12 = scmp.lt.s32.totalorder %s523_s16, %s523_s16 }
  0x28   :  { %445 = vmatprep.subr.mxu1 %v551_v0  ;;  %456 = vmatprep.subr.mxu0 %v551_v0 }
  0x29   :  { %446 = vmatpush3.msra.mxu1 %v181_v20  ;;  %457 = vmatpush3.msra.mxu0 %v275_v24  ;;  %p530_p13 = por %p529_p12, %p528_p11 }
  0x2a   :  { %447 = vmatprep.subr.mxu1 %v551_v0  ;;  %458 = vmatprep.subr.mxu0 %v551_v0 }
  0x2b   :  { %448 = vmatpush3.msra.mxu1 %v180_v21  ;;  %459 = vmatpush3.msra.mxu0 %v274_v25  ;;  %p531_p0 = pnand %p530_p13, %p524_p10 }
  0x2c   :  { %449 = vmatprep.subr.mxu1 %v551_v0  ;;  %460 = vmatprep.subr.mxu0 %v551_v0 }
  0x2d   :  { %450 = vmatpush3.msra.mxu1 %v179_v22  ;;  %461 = vmatpush3.msra.mxu0 %v273_v26 }
  0x2e   :  { %462 = vmatprep.subr.mxu0 %v551_v0 }
  0x2f   :  { %463 = vmatpush3.msra.mxu0 %v272_v42 }
  0x30   :  { %464 = vmatprep.subr.mxu0 %v551_v0 }
  0x31   :  { %465 = vmatpush3.msra.mxu0 %v271_v43 }
  0x32   :  { %466 = vmatprep.subr.mxu0 %v551_v0 }
  0x33   :  { %467 = vmatpush3.msra.mxu0 %v270_v44 }
  0x34   :  { %468 = vmatprep.subr.mxu0 %v551_v0 }
  0x35   :  { %469 = vmatpush3.msra.mxu0 %v269_v45 }
  0xe5   :  { %v139_v7 = vpop.f32.mrf.mxu0 }
  0xe6   :  { %v140_v8 = vadd.f32 %v393_v6, %v139_v7 }
  0xe7   :  { %v434_v9 = vpop.f32.mrf.mxu0 }
  0xe8   :  { %v143_v10 = vmul.f32 0.01, %v140_v8 }
  0xea   :  { %v144_v11 = vmax.f32 %v140_v8, %v143_v10 }
  0xec   :  { %v146_v12 = vsel %vm145_vm2, %v144_v11, 0.0  ;;  %v151_v13 = vmul.f32 %v144_v11, %v144_v11 }
  0xed   :  { %147 = vadd.xlane.f32.xlu0 %v146_v12 }
  0xee   :  { %v152_v14 = vsel %vm145_vm2, %v151_v13, 0.0 }
  0xf1   :  { %153 = vadd.xlane.f32.xlu0 %v152_v14 }
 0x176   :  { %v148_v27 = vpop.xlane.xlu0 %147 }
 0x177   :  { %v150_v28 = vmul.f32 0.015625, %v148_v27 }
 0x179   :  { %v156_v30 = vmul.f32 %v150_v28, %v150_v28  ;;  %v159_v35 = vsub.f32 %v144_v11, %v150_v28 }
 0x17a   :  { %v154_v29 = vpop.xlane.xlu0 %153 }
 0x17b   :  { %v155_v31 = vmul.f32 0.015625, %v154_v29 }
 0x17d   :  { %v157_v32 = vsub.f32 %v155_v31, %v156_v30 }
 0x17f   :  { %v158_v33 = vmax.f32 %v157_v32, 0.0 }
 0x181   :  { %v160_v34 = vadd.f32 1e-05, %v158_v33 }
 0x183   :  { %479 = vrsqrt.f32 %v160_v34 }
 0x190   :  { %v480_v36 = vpop.eup %479 }
 0x191   :  { %v162_v38 = vmul.f32 %v480_v36, %v159_v35 }
 0x193   :  { %v170_v40 = vmul.f32 %v395_v37, %v162_v38 }
 0x195   :  { %v178_v41 = vadd.f32 %v396_v39, %v170_v40 }
 0x197   :  { %452 = vmatmul.mubr.msk.f32.vlgmr.msra.gmra.mxu1 %vm145_vm2, %v178_v41 }
 0x257   :  { %v263_v47 = vpop.f32.mrf.mxu1 }
 0x258   :  { %v264_v48 = vadd.f32 %v397_v46, %v263_v47 }
 0x259   :  { %v453_v49 = vpop.f32.mrf.mxu1 }
 0x25a   :  { %v267_v50 = vmul.f32 0.01, %v264_v48 }
 0x25c   :  { %v268_v51 = vmax.f32 %v264_v48, %v267_v50 }
 0x25e   :  { %471 = vmatmul.mubr.msk.f32.vlgmr.msra.gmra.mxu0 %vm145_vm2, %v268_v51  ;;  %v357_v52 = vmul.f32 %v268_v51, %v268_v51 }
 0x260   :  { %v358_v53 = vsel %vm145_vm2, %v357_v52, 0.0 }
 0x261   :  { %359 = vadd.xlane.f32.xlu1 %v358_v53 }
 0x2ea   :  { %v360_v60 = vpop.xlane.xlu1 %359 }
 0x31e   :  { %v353_v55 = vpop.f32.mrf.mxu0 }
 0x31f   :  { %v354_v56 = vadd.f32 %v399_v54, %v353_v55 }
 0x320   :  { %v472_v57 = vpop.f32.mrf.mxu0 }
 0x321   :  { %v361_v58 = vmul.f32 %v354_v56, %v354_v56 }
 0x323   :  { %v362_v59 = vsel %vm69_vm1, %v361_v58, 0.0 }
 0x324   :  { %363 = vadd.xlane.f32.xlu1 %v362_v59 }
 0x3ad   :  { %v364_v61 = vpop.xlane.xlu1 %363 }
 0x3ae   :  { %v365_v62 = vadd.f32 %v364_v61, %v360_v60 }
 0x3b0   :  { %v366_v63 = vmax.f32 %v365_v62, 1e-24 }
 0x3b2   :  { %481 = vrsqrt.f32 %v366_v63 }
 0x3bf   :  { %v482_v0 = vpop.eup %481 }
 0x3c0   :  { %v370_v1 = vmul.f32 %v482_v0, %v354_v56  ;;  %v368_v2 = vmul.f32 %v482_v0, %v268_v51 }
 0x3c2   :  { %372 = vrot.lane.b32.xlu0 %v370_v1, %s553_s6  ;;  %369 = vst.msk [vmem:[#allocation7] sm:$0xff] %vm145_vm2, %v368_v2 }
 0x434   :  { %v373_v3 = vpop.permute.xlu0 %372 }
 0x435   :  { %376 = vst.msk [vmem:[#allocation7] sm:$0xff] %vm375_vm3, %v373_v3 }
 0x436   :  { %534 = shalt.err (!%p531_p0)
}
 0x437   :  { %386 = dma.vmem_to_hbm [thread:$0]  %s384_s8, 128, %s729_s9, [#allocation4]  }
 0x438   :  { %547 = dma.done.wait [#allocation4], 128  }
 0x439   :  { %548 = vsyncadd [#allocation4], 4294967168 }
 0x43a   :  { %390 = vsyncpa [#allocation3], 1 }
 0x43b   :  { %391 = vsyncpa [#allocation6], 1 }
 0x43c   :  { %392 = vsyncpa [#allocation4], 1 }

</bundles_post_ra>
